<compile_context>
chip_gen: v6e
topology: v6e:2x2x1
jax: 0.10.0
libtpu: 0.0.40
codegen_flags: <defaults>
</compile_context>

<pallas_src>
import functools

import jax
import jax.numpy as jnp
from jax.experimental import pallas as pl
from jax.experimental.pallas import tpu as pltpu

OUT_CHANNELS = 64          # "out_channels = 64" in the reference script
TILE_M = 512               # row tile of A_hat (output rows)
TILE_K = 512               # reduction tile of A_hat (neighbor columns)


def _round_up(x, m):
    return (x + m - 1) // m * m


def _detect_tpu():
    """Returns (vmem_limit_bytes, chip_has_multiple_tensorcores)."""
    try:
        kind = jax.devices()[0].device_kind.lower()
    except Exception:
        kind = ""
    multi_tc = "7" in kind      # v7x: 2 TensorCores/chip, 64 MiB VMEM each
    try:
        cap = int(pltpu.get_tpu_info().vmem_capacity_bytes)
    except Exception:
        cap = (64 if multi_tc else 128) * 1024 * 1024
    # ~25% headroom for compiler-internal scratch; never below the 32 MiB
    # scoped default we previously relied on, never above 100 MiB.
    limit = max(32 * 1024 * 1024, min(cap * 3 // 4, 100 * 1024 * 1024))
    return limit, multi_tc


# ---------------------------------------------------------------------------
# Pallas kernel 1: feature transform  XW = X @ W   (row-tiled)
# ---------------------------------------------------------------------------
def _transform_kernel(x_ref, w_ref, o_ref):
    o_ref[...] = jnp.dot(
        x_ref[...], w_ref[...], preferred_element_type=jnp.float32
    ).astype(o_ref.dtype)


def gcn_transform(x_bf16, w_bf16, *, vmem_limit, tm=TILE_M):
    n, cin = x_bf16.shape
    cout = w_bf16.shape[1]
    assert n % tm == 0
    return pl.pallas_call(
        _transform_kernel,
        out_shape=jax.ShapeDtypeStruct((n, cout), jnp.bfloat16),
        grid_spec=pltpu.PrefetchScalarGridSpec(
            num_scalar_prefetch=0,
            grid=(n // tm,),
            in_specs=[
                pl.BlockSpec((tm, cin), lambda i: (i, 0)),
                pl.BlockSpec((cin, cout), lambda i: (0, 0)),   # resident
            ],
            out_specs=pl.BlockSpec((tm, cout), lambda i: (i, 0)),
        ),
        compiler_params=pltpu.CompilerParams(
            dimension_semantics=("parallel",),
            vmem_limit_bytes=vmem_limit,
        ),
    )(x_bf16, w_bf16)


# ---------------------------------------------------------------------------
# Pallas kernel 2: propagation  out = A_hat @ XW + b  (+ReLU), tiled over A
# ---------------------------------------------------------------------------
def _prop_kernel(a_ref, xw_ref, b_ref, o_ref, acc_ref, *,
                 apply_relu, resident_xw, tk):
    k = pl.program_id(1)

    @pl.when(k == 0)
    def _():
        acc_ref[...] = jnp.zeros_like(acc_ref)

    if resident_xw:
        # Whole XW lives in VMEM (constant block index) -> slice the k-th chunk.
        start = pl.multiple_of(k * tk, tk)
        xw = xw_ref[pl.ds(start, tk), :]
    else:
        xw = xw_ref[...]

    acc_ref[...] += jnp.dot(a_ref[...], xw, preferred_element_type=jnp.float32)

    @pl.when(k == pl.num_programs(1) - 1)
    def _():
        out = acc_ref[...] + b_ref[...]
        if apply_relu:
            out = jnp.maximum(out, 0.0)
        o_ref[...] = out.astype(o_ref.dtype)


def gcn_propagate(a_bf16, xw_bf16, bias_f32, *, apply_relu, out_dtype,
                  vmem_limit, tm=TILE_M, tk=TILE_K):
    n = a_bf16.shape[0]
    c = xw_bf16.shape[1]
    assert n % tm == 0 and n % tk == 0, "pad n to a multiple of max(tm, tk)"

    # Keep the full XW operand resident in VMEM when it comfortably fits
    # (budget 2x for Pallas buffering + leave room for A double-buffers/acc).
    resident_xw = (4 * n * c) <= (vmem_limit // 2)
    if resident_xw:
        xw_spec = pl.BlockSpec((n, c), lambda i, k: (0, 0))     # fetched once
    else:
        xw_spec = pl.BlockSpec((tk, c), lambda i, k: (k, 0))    # streamed

    kernel = functools.partial(_prop_kernel, apply_relu=apply_relu,
                               resident_xw=resident_xw, tk=tk)
    return pl.pallas_call(
        kernel,
        out_shape=jax.ShapeDtypeStruct((n, c), out_dtype),
        grid_spec=pltpu.PrefetchScalarGridSpec(
            num_scalar_prefetch=0,
            grid=(n // tm, n // tk),          # reduction axis last
            in_specs=[
                pl.BlockSpec((tm, tk), lambda i, k: (i, k)),    # A_hat tile
                xw_spec,                                        # XW operand
                pl.BlockSpec((1, c), lambda i, k: (0, 0)),      # bias
            ],
            out_specs=pl.BlockSpec((tm, c), lambda i, k: (i, 0)),
            scratch_shapes=[pltpu.VMEM((tm, c), jnp.float32)],
        ),
        compiler_params=pltpu.CompilerParams(
            dimension_semantics=("parallel", "arbitrary"),
            vmem_limit_bytes=vmem_limit,
        ),
    )(a_bf16, xw_bf16, bias_f32)


# ---------------------------------------------------------------------------
# Pallas kernel 3: fully fused 3-layer encoder for small graphs (VMEM-resident)
# ---------------------------------------------------------------------------
def _fused_kernel(a_ref, x_ref, w1_ref, b1_ref, w12_ref, b12_ref,
                  w2_ref, b2_ref, o_ref):
    def layer(h_bf16, w_ref, b_ref, relu):
        xw = jnp.dot(h_bf16, w_ref[...], preferred_element_type=jnp.float32)
        # Read A per use (no long-lived hoisted value -> less vreg pressure).
        out = jnp.dot(a_ref[...], xw.astype(jnp.bfloat16),
                      preferred_element_type=jnp.float32) + b_ref[...]
        if relu:
            out = jnp.maximum(out, 0.0)
        return out

    h = layer(x_ref[...], w1_ref, b1_ref, False)                 # conv1
    h = layer(h.astype(jnp.bfloat16), w12_ref, b12_ref, True)    # conv12+relu
    o_ref[...] = layer(h.astype(jnp.bfloat16), w2_ref, b2_ref, False)  # conv2


def gcn_fused(a_bf16, x_bf16, w1, b1, w12, b12, w2, b2, *, vmem_limit):
    n = a_bf16.shape[0]
    c_out = w2.shape[1]
    vmem = pl.BlockSpec(memory_space=pltpu.MemorySpace.VMEM)
    return pl.pallas_call(
        _fused_kernel,
        out_shape=jax.ShapeDtypeStruct((n, c_out), jnp.float32),
        in_specs=[vmem] * 8,
        out_specs=vmem,
        compiler_params=pltpu.CompilerParams(vmem_limit_bytes=vmem_limit),
    )(a_bf16, x_bf16, w1, b1, w12, b12, w2, b2)


# ---------------------------------------------------------------------------
# Glue: dense normalized adjacency + parameters (plain JAX)
# ---------------------------------------------------------------------------
def normalized_adjacency(edge_index, num_nodes):
    """A_hat = D^-1/2 (A + I) D^-1/2 (f32, unpadded), matching gcn_norm.
    TODO(synk): duplicate edges are deduplicated here; PyG counts multiplicity.
    """
    src = edge_index[0]
    dst = edge_index[1]
    a = jnp.zeros((num_nodes, num_nodes), jnp.float32)
    a = a.at[dst, src].set(1.0)                       # message flows src -> dst
    a = jnp.maximum(a, jnp.eye(num_nodes, dtype=jnp.float32))  # self loops
    deg = a.sum(axis=1)
    d_inv_sqrt = jnp.where(deg > 0, 1.0 / jnp.sqrt(deg), 0.0)
    return d_inv_sqrt[:, None] * a * d_inv_sqrt[None, :]


def init_gcn_params(key, in_channels, out_channels):
    """Glorot-uniform weight + zero bias, as in GCNConv."""
    wkey, _ = jax.random.split(key)
    limit = jnp.sqrt(6.0 / (in_channels + out_channels))
    w = jax.random.uniform(
        wkey, (in_channels, out_channels), jnp.float32, -limit, limit
    )
    b = jnp.zeros((out_channels,), jnp.float32)
    return w, b


def _pad_weight_bf16(w, rows_p, cols_p):
    r, c = w.shape
    return jnp.pad(w, ((0, rows_p - r), (0, cols_p - c))).astype(jnp.bfloat16)


def _pad_bias_f32(b, cols_p):
    return jnp.pad(b, (0, cols_p - b.shape[0])).reshape(1, cols_p).astype(jnp.float32)


class GCNEncoderPallas:
    def __init__(self, key, in_channels, out_channels):
        k1, k2, k3 = jax.random.split(key, 3)
        c1, c2, c3 = 4 * out_channels, 2 * out_channels, out_channels

        # f32 master params (also used by the reference check)
        self.w1_f32, self.b1_f32 = init_gcn_params(k1, in_channels, c1)
        self.w12_f32, self.b12_f32 = init_gcn_params(k2, c1, c2)
        self.w2_f32, self.b2_f32 = init_gcn_params(k3, c2, c3)

        # generation-aware VMEM budget (v7x: 64 MiB phys / 2 TCs; v5e/v6e: 128)
        self.vmem_limit, self.multi_tc = _detect_tpu()

        # lane-dense padded kernel params (bf16 weights, f32 biases)
        self.out_channels = out_channels
        self.cin_p = _round_up(in_channels, 128)
        self.c1_p = _round_up(c1, 128)
        self.c2_p = _round_up(c2, 128)
        self.c3_p = _round_up(c3, 128)

        self.w1 = _pad_weight_bf16(self.w1_f32, self.cin_p, self.c1_p)
        self.b1 = _pad_bias_f32(self.b1_f32, self.c1_p)
        self.w12 = _pad_weight_bf16(self.w12_f32, self.c1_p, self.c2_p)
        self.b12 = _pad_bias_f32(self.b12_f32, self.c2_p)
        self.w2 = _pad_weight_bf16(self.w2_f32, self.c2_p, self.c3_p)
        self.b2 = _pad_bias_f32(self.b2_f32, self.c3_p)

    def _fused_fits(self, n_p):
        """Conservative VMEM estimate for the single-kernel fused path."""
        c_max = max(self.c1_p, self.c2_p, self.c3_p)
        est = (n_p * n_p * 2                                   # A_hat bf16
               + n_p * self.cin_p * 2                          # X bf16
               + (self.cin_p * self.c1_p + self.c1_p * self.c2_p
                  + self.c2_p * self.c3_p) * 2                 # weights
               + n_p * self.c3_p * 4                           # output f32
               + 3 * n_p * c_max * 4)                          # intermediates
        return est < int(0.6 * self.vmem_limit)

    def __call__(self, x, edge_index, *, use_fused=None):
        n, cin = x.shape
        a_hat = normalized_adjacency(edge_index, n)

        n_p_fused = _round_up(n, 128)
        if use_fused is None:
            use_fused = self._fused_fits(n_p_fused)
            # On 2-TC chips (v7x) the un-gridded fused kernel idles one core;
            # prefer the megacore-shardable tiled path beyond a few hundred rows.
            if self.multi_tc and n_p_fused > 512:
                use_fused = False

        n_p = n_p_fused if use_fused else _round_up(n, max(TILE_M, TILE_K))

        a_pad = jnp.pad(a_hat, ((0, n_p - n), (0, n_p - n))).astype(jnp.bfloat16)
        x_pad = jnp.pad(x, ((0, n_p - n), (0, self.cin_p - cin))).astype(jnp.bfloat16)

        if use_fused:
            out = gcn_fused(a_pad, x_pad, self.w1, self.b1,
                            self.w12, self.b12, self.w2, self.b2,
                            vmem_limit=self.vmem_limit)
        else:
            vl = self.vmem_limit
            # conv1 (no activation)
            xw = gcn_transform(x_pad, self.w1, vmem_limit=vl)
            h = gcn_propagate(a_pad, xw, self.b1, apply_relu=False,
                              out_dtype=jnp.bfloat16, vmem_limit=vl)
            # conv12 + relu
            xw = gcn_transform(h, self.w12, vmem_limit=vl)
            h = gcn_propagate(a_pad, xw, self.b12, apply_relu=True,
                              out_dtype=jnp.bfloat16, vmem_limit=vl)
            # conv2 (no activation)
            xw = gcn_transform(h, self.w2, vmem_limit=vl)
            out = gcn_propagate(a_pad, xw, self.b2, apply_relu=False,
                                out_dtype=jnp.float32, vmem_limit=vl)

        return out[:n, :self.out_channels]

    def reference(self, x, edge_index):
        """Plain-JAX f32 reference of the same forward pass."""
        a = normalized_adjacency(edge_index, x.shape[0])
        h = a @ (x @ self.w1_f32) + self.b1_f32
        h = jnp.maximum(a @ (h @ self.w12_f32) + self.b12_f32, 0.0)
        return a @ (h @ self.w2_f32) + self.b2_f32


# ---------------------------------------------------------------------------
if __name__ == "__main__":
    key = jax.random.PRNGKey(0)
    k_x, k_e, k_p, k_x2, k_e2 = jax.random.split(key, 5)

    num_nodes = 32
    in_channels = 16
    num_edges = 64

    x = jax.random.normal(k_x, (num_nodes, in_channels), jnp.float32)
    edge_index = jax.random.randint(k_e, (2, num_edges), 0, num_nodes, jnp.int32)

    model = GCNEncoderPallas(k_p, in_channels, OUT_CHANNELS)

    # Small graph -> fused single-kernel path
    out = jax.block_until_ready(model(x, edge_index))
    assert out.shape == (num_nodes, OUT_CHANNELS)
    assert bool(jnp.all(jnp.isfinite(out)))
    ref = model.reference(x, edge_index)
    assert bool(jnp.allclose(out, ref, rtol=0.1, atol=0.1))

    # Larger graph -> tiled transform + propagation path (grid (2, 2) with
    # 512-wide tiles, resident XW, f32 accumulator)
    n2, e2 = 1024, 4096
    x2 = jax.random.normal(k_x2, (n2, in_channels), jnp.float32)
    ei2 = jax.random.randint(k_e2, (2, e2), 0, n2, jnp.int32)
    out2 = jax.block_until_ready(model(x2, ei2, use_fused=False))
    assert out2.shape == (n2, OUT_CHANNELS)
    assert bool(jnp.all(jnp.isfinite(out2)))
    ref2 = model.reference(x2, ei2)
    assert bool(jnp.allclose(out2, ref2, rtol=0.1, atol=0.1))

    print("KERNEL_OK")
</pallas_src>

<mosaic_0001>
module attributes {stable_mosaic.version = 11 : i64} {
  func.func @_fused_kernel(%arg0: memref<128x128xbf16, #tpu.memory_space<vmem>>, %arg1: memref<128x128xbf16, #tpu.memory_space<vmem>>, %arg2: memref<128x256xbf16, #tpu.memory_space<vmem>>, %arg3: memref<1x256xf32, #tpu.memory_space<vmem>>, %arg4: memref<256x128xbf16, #tpu.memory_space<vmem>>, %arg5: memref<1x128xf32, #tpu.memory_space<vmem>>, %arg6: memref<128x128xbf16, #tpu.memory_space<vmem>>, %arg7: memref<1x128xf32, #tpu.memory_space<vmem>>, %arg8: memref<128x128xf32, #tpu.memory_space<vmem>>) attributes {dimension_semantics = [], scalar_prefetch = 0 : i64, scratch_operands = 0 : i64, tpu.core_type = #tpu.core_type<tc>} {
    %c0 = arith.constant 0 : index
    %c0_0 = arith.constant 0 : index
    %0 = vector.load %arg1[%c0, %c0_0] : memref<128x128xbf16, #tpu.memory_space<vmem>>, vector<128x128xbf16>
    %c0_1 = arith.constant 0 : index
    %c0_2 = arith.constant 0 : index
    %1 = vector.load %arg2[%c0_1, %c0_2] : memref<128x256xbf16, #tpu.memory_space<vmem>>, vector<128x256xbf16>
    %cst = arith.constant dense<0.000000e+00> : vector<128x256xf32>
    %2 = tpu.matmul %0, %1, %cst {dimension_numbers = #tpu.dot_dimension_numbers<[1], [0], [0], [1], [0, 0, 1, 1], [], []>} : vector<128x128xbf16>, vector<128x256xbf16>, vector<128x256xf32> -> vector<128x256xf32>
    %c0_3 = arith.constant 0 : index
    %c0_4 = arith.constant 0 : index
    %3 = vector.load %arg0[%c0_3, %c0_4] : memref<128x128xbf16, #tpu.memory_space<vmem>>, vector<128x128xbf16>
    %4 = arith.truncf %2 : vector<128x256xf32> to vector<128x256xbf16>
    %cst_5 = arith.constant dense<0.000000e+00> : vector<128x256xf32>
    %5 = tpu.matmul %3, %4, %cst_5 {dimension_numbers = #tpu.dot_dimension_numbers<[1], [0], [0], [1], [0, 0, 1, 1], [], []>} : vector<128x128xbf16>, vector<128x256xbf16>, vector<128x256xf32> -> vector<128x256xf32>
    %c0_6 = arith.constant 0 : index
    %c0_7 = arith.constant 0 : index
    %6 = vector.load %arg3[%c0_6, %c0_7] : memref<1x256xf32, #tpu.memory_space<vmem>>, vector<1x256xf32>
    %7 = vector.broadcast %6 : vector<1x256xf32> to vector<128x256xf32>
    %8 = arith.addf %5, %7 : vector<128x256xf32>
    %9 = arith.truncf %8 : vector<128x256xf32> to vector<128x256xbf16>
    %c0_8 = arith.constant 0 : index
    %c0_9 = arith.constant 0 : index
    %10 = vector.load %arg4[%c0_8, %c0_9] : memref<256x128xbf16, #tpu.memory_space<vmem>>, vector<256x128xbf16>
    %cst_10 = arith.constant dense<0.000000e+00> : vector<128x128xf32>
    %11 = tpu.matmul %9, %10, %cst_10 {dimension_numbers = #tpu.dot_dimension_numbers<[1], [0], [0], [1], [0, 0, 1, 1], [], []>} : vector<128x256xbf16>, vector<256x128xbf16>, vector<128x128xf32> -> vector<128x128xf32>
    %c0_11 = arith.constant 0 : index
    %c0_12 = arith.constant 0 : index
    %12 = vector.load %arg0[%c0_11, %c0_12] : memref<128x128xbf16, #tpu.memory_space<vmem>>, vector<128x128xbf16>
    %13 = arith.truncf %11 : vector<128x128xf32> to vector<128x128xbf16>
    %cst_13 = arith.constant dense<0.000000e+00> : vector<128x128xf32>
    %14 = tpu.matmul %12, %13, %cst_13 {dimension_numbers = #tpu.dot_dimension_numbers<[1], [0], [0], [1], [0, 0, 1, 1], [], []>} : vector<128x128xbf16>, vector<128x128xbf16>, vector<128x128xf32> -> vector<128x128xf32>
    %c0_14 = arith.constant 0 : index
    %c0_15 = arith.constant 0 : index
    %15 = vector.load %arg5[%c0_14, %c0_15] : memref<1x128xf32, #tpu.memory_space<vmem>>, vector<1x128xf32>
    %16 = vector.broadcast %15 : vector<1x128xf32> to vector<128x128xf32>
    %17 = arith.addf %14, %16 : vector<128x128xf32>
    %cst_16 = arith.constant 0.000000e+00 : f32
    %18 = vector.broadcast %cst_16 : f32 to vector<128x128xf32>
    %19 = arith.maximumf %17, %18 : vector<128x128xf32>
    %20 = arith.truncf %19 : vector<128x128xf32> to vector<128x128xbf16>
    %c0_17 = arith.constant 0 : index
    %c0_18 = arith.constant 0 : index
    %21 = vector.load %arg6[%c0_17, %c0_18] : memref<128x128xbf16, #tpu.memory_space<vmem>>, vector<128x128xbf16>
    %cst_19 = arith.constant dense<0.000000e+00> : vector<128x128xf32>
    %22 = tpu.matmul %20, %21, %cst_19 {dimension_numbers = #tpu.dot_dimension_numbers<[1], [0], [0], [1], [0, 0, 1, 1], [], []>} : vector<128x128xbf16>, vector<128x128xbf16>, vector<128x128xf32> -> vector<128x128xf32>
    %c0_20 = arith.constant 0 : index
    %c0_21 = arith.constant 0 : index
    %23 = vector.load %arg0[%c0_20, %c0_21] : memref<128x128xbf16, #tpu.memory_space<vmem>>, vector<128x128xbf16>
    %24 = arith.truncf %22 : vector<128x128xf32> to vector<128x128xbf16>
    %cst_22 = arith.constant dense<0.000000e+00> : vector<128x128xf32>
    %25 = tpu.matmul %23, %24, %cst_22 {dimension_numbers = #tpu.dot_dimension_numbers<[1], [0], [0], [1], [0, 0, 1, 1], [], []>} : vector<128x128xbf16>, vector<128x128xbf16>, vector<128x128xf32> -> vector<128x128xf32>
    %c0_23 = arith.constant 0 : index
    %c0_24 = arith.constant 0 : index
    %26 = vector.load %arg7[%c0_23, %c0_24] : memref<1x128xf32, #tpu.memory_space<vmem>>, vector<1x128xf32>
    %27 = vector.broadcast %26 : vector<1x128xf32> to vector<128x128xf32>
    %28 = arith.addf %25, %27 : vector<128x128xf32>
    %c0_25 = arith.constant 0 : index
    %c0_26 = arith.constant 0 : index
    %29 = vector.load %arg8[%c0_25, %c0_26] : memref<128x128xf32, #tpu.memory_space<vmem>>, vector<128x128xf32>
    tpu.vector_store %arg8[%c0_25, %c0_26], %28 {strides = array<i32>} : memref<128x128xf32, #tpu.memory_space<vmem>>, vector<128x128xf32>,
    return
  }
}

</mosaic_0001>

<bundles_post_ra>
// kernel: tpu_custom_call.1
= control target key start
LH: loop header
LB: loop body
LE: loop exit
PB: predicated region body
PF: predicated region fallthrough
CT: control target
= control target key end

     0   :  { %13 = vsyncpa [#allocation3], 0  ;;  %s1989_s0 = inlined_call_operand.hbm [shape: bf16[128,128], index: 0, kind: input, shape index: {}]   ;;  %s1990_s1 = inlined_call_operand.hbm [shape: bf16[128,128], index: 1, kind: input, shape index: {}]   ;;  %s1991_s2 = inlined_call_operand.hbm [shape: bf16[128,256], index: 2, kind: input, shape index: {}]   ;;  %s1992_s3 = inlined_call_operand.vmem [shape: f32[1,256], index: 3, kind: input, shape index: {}]   ;;  %s1993_s4 = inlined_call_operand.hbm [shape: bf16[256,128], index: 4, kind: input, shape index: {}]   ;;  %s1994_s5 = inlined_call_operand.vmem [shape: f32[1,128], index: 5, kind: input, shape index: {}]   ;;  %s1995_s6 = inlined_call_operand.hbm [shape: bf16[128,128], index: 6, kind: input, shape index: {}]   ;;  %s1996_s7 = inlined_call_operand.vmem [shape: f32[1,128], index: 7, kind: input, shape index: {}]   ;;  %s1997_s8 = inlined_call_operand.hbm [shape: f32[128,128], index: 8, kind: output, shape index: {}]  }
   0x1   :  { %14 = vsyncpa [#allocation6], 0 }
   0x2   :  { %15 = vsyncpa [#allocation9], 0 }
   0x3   :  { %16 = vsyncpa [#allocation4], 0  ;;  %s1747_s27 = smov [#allocation5]   ;;  %s1748_s29 = smov [#allocation8]  }
   0x4   :  { %s34_s28 = sshll.u32 %s1747_s27, 4  ;;  %s60_s30 = sshll.u32 %s1748_s29, 4  ;;  %s35_s28 = int_to_ptr.vmem [resolvable:$true] %s34_s28  ;;  %s61_s30 = int_to_ptr.vmem [resolvable:$true] %s60_s30 }
   0x5   :  { %s1627_s9 = scalar_lea.vmem %s35_s28, 1024  ;;  %p1632_p1 = scmp.lt.s32.totalorder %s35_s28, %s35_s28 }
   0x6   :  { %p1628_p0 = scmp.ne.s32.totalorder %s35_s28, %s1627_s9  ;;  %p1633_p2 = scmp.lt.s32.totalorder %s1627_s9, %s1627_s9 }
   0x8   :  { %p1634_p3 = por %p1633_p2, %p1632_p1 }
   0xa   :  { %p1635_p4 = pnand %p1634_p3, %p1628_p0 }
   0xc   :  { %1638 = shalt.err (!%p1635_p4)
}
   0xd   :  { %s1749_s10 = smov 64   ;;  %s1750_s11 = smov 4  }
   0xe   :  { %40 = dma.hbm_to_vmem [thread:$0]  %s1990_s1, 1024, %s35_s28, [#allocation6], %s1749_s10, %s1749_s10, %s1750_s11  }
   0xf   :  { %s1647_s14 = scalar_lea.vmem %s61_s30, 2048  ;;  %p1652_p6 = scmp.lt.s32.totalorder %s61_s30, %s61_s30 }
  0x10   :  { %p1648_p5 = scmp.ne.s32.totalorder %s61_s30, %s1647_s14  ;;  %p1653_p7 = scmp.lt.s32.totalorder %s1647_s14, %s1647_s14 }
  0x12   :  { %p1654_p8 = por %p1653_p7, %p1652_p6 }
  0x14   :  { %p1655_p9 = pnand %p1654_p8, %p1648_p5 }
  0x16   :  { %1658 = shalt.err (!%p1655_p9)
}
  0x17   :  { %66 = dma.hbm_to_vmem [thread:$0]  %s1993_s4, 2048, %s61_s30, [#allocation9], %s1749_s10, %s1749_s10, %s1750_s11  }
  0x18   :  { %s1751_s17 = smov [#allocation2]   ;;  %s1752_s19 = smov [#allocation7]  }
  0x19   :  { %s22_s18 = sshll.u32 %s1751_s17, 4  ;;  %s46_s20 = sshll.u32 %s1752_s19, 4  ;;  %s23_s18 = int_to_ptr.vmem [resolvable:$true] %s22_s18  ;;  %s47_s20 = int_to_ptr.vmem [resolvable:$true] %s46_s20 }
  0x1a   :  { %s1667_s1 = scalar_lea.vmem %s23_s18, 1024  ;;  %p1672_p11 = scmp.lt.s32.totalorder %s23_s18, %s23_s18 }
  0x1b   :  { %p1668_p10 = scmp.ne.s32.totalorder %s23_s18, %s1667_s1  ;;  %p1673_p12 = scmp.lt.s32.totalorder %s1667_s1, %s1667_s1 }
  0x1d   :  { %p1674_p13 = por %p1673_p12, %p1672_p11 }
  0x1f   :  { %p1675_p0 = pnand %p1674_p13, %p1668_p10 }
  0x21   :  { %1678 = shalt.err (!%p1675_p0)
}
  0x22   :  { %28 = dma.hbm_to_vmem [thread:$0]  %s1989_s0, 1024, %s23_s18, [#allocation3], %s1749_s10, %s1749_s10, %s1750_s11  }
  0x23   :  { %s1687_s4 = scalar_lea.vmem %s47_s20, 2048  ;;  %p1692_p2 = scmp.lt.s32.totalorder %s47_s20, %s47_s20 }
  0x24   :  { %p1688_p1 = scmp.ne.s32.totalorder %s47_s20, %s1687_s4  ;;  %p1693_p3 = scmp.lt.s32.totalorder %s1687_s4, %s1687_s4 }
  0x26   :  { %p1694_p4 = por %p1693_p3, %p1692_p2 }
  0x28   :  { %p1695_p5 = pnand %p1694_p4, %p1688_p1 }
  0x2a   :  { %1698 = shalt.err (!%p1695_p5)
}
  0x2b   :  { %s1753_s23 = smov 128   ;;  %s1754_s24 = smov 8  }
  0x2c   :  { %52 = dma.hbm_to_vmem [thread:$0]  %s1991_s2, 2048, %s47_s20, [#allocation6], %s1753_s23, %s1753_s23, %s1754_s24  }
  0x2d   :  { %s1755_s27 = smov [#allocation10]  }
  0x2e   :  { %s74_s28 = sshll.u32 %s1755_s27, 4  ;;  %s75_s28 = int_to_ptr.vmem [resolvable:$true] %s74_s28 }
  0x2f   :  { %s1707_s0 = scalar_lea.vmem %s75_s28, 1024  ;;  %p1712_p7 = scmp.lt.s32.totalorder %s75_s28, %s75_s28 }
  0x30   :  { %p1708_p6 = scmp.ne.s32.totalorder %s75_s28, %s1707_s0  ;;  %p1713_p8 = scmp.lt.s32.totalorder %s1707_s0, %s1707_s0 }
  0x32   :  { %p1714_p9 = por %p1713_p8, %p1712_p7 }
  0x34   :  { %p1715_p10 = pnand %p1714_p9, %p1708_p6 }
  0x36   :  { %1718 = shalt.err (!%p1715_p10)
}
  0x37   :  { %80 = dma.hbm_to_vmem [thread:$0]  %s1995_s6, 1024, %s75_s28, [#allocation9], %s1749_s10, %s1749_s10, %s1750_s11  }
  0x38   :  { %1739 = dma.done.wait [#allocation3], 1024  }
  0x39   :  { %1740 = vsyncadd [#allocation3], 4294966272 }
  0x3a   :  { %1741 = dma.done.wait [#allocation6], 3072  }
  0x3b   :  { %1742 = vsyncadd [#allocation6], 4294964224 }
  0x3c   :  { %1743 = dma.done.wait [#allocation9], 3072  }
  0x3d   :  { %1744 = vsyncadd [#allocation9], 4294964224  ;;  %v1756_v0 = vmov 0   ;;  %v1555_v1 = vld [vmem:[#allocation7 + $0x74] ss:$8 sps:$4 sm:$0xff]   ;;  %v1579_v17 = vld [vmem:[#allocation5] sm:$0xff]  }
  0x3e   :  { %291 = vmatprep.mubr.bf16.mxu0 %v1756_v0  ;;  %496 = vmatprep.mubr.bf16.mxu1 %v1756_v0  ;;  %v1557_v2 = vld [vmem:[#allocation7 + $0x70] ss:$8 sps:$4 sm:$0xff]   ;;  %v1558_v3 = vld [vmem:[#allocation7 + $0x64] ss:$8 sps:$4 sm:$0xff]   ;;  %v1560_v4 = vld [vmem:[#allocation7 + $0x60] ss:$8 sps:$4 sm:$0xff]  }
  0x3f   :  { %259 = vmatprep.subr.bf16.mxu0 %v1555_v1  ;;  %v1561_v5 = vld [vmem:[#allocation7 + $0x54] ss:$8 sps:$4 sm:$0xff]   ;;  %v1563_v6 = vld [vmem:[#allocation7 + $0x50] ss:$8 sps:$4 sm:$0xff]   ;;  %v1564_v7 = vld [vmem:[#allocation7 + $0x44] ss:$8 sps:$4 sm:$0xff]  }
  0x40   :  { %260 = vmatpush1.bf16.msra.mxu0 %v1557_v2  ;;  %v1566_v8 = vld [vmem:[#allocation7 + $0x40] ss:$8 sps:$4 sm:$0xff]   ;;  %v1567_v9 = vld [vmem:[#allocation7 + $0x34] ss:$8 sps:$4 sm:$0xff]   ;;  %v1569_v10 = vld [vmem:[#allocation7 + $0x30] ss:$8 sps:$4 sm:$0xff]  }
  0x41   :  { %261 = vmatprep.subr.bf16.mxu0 %v1558_v3  ;;  %v1570_v11 = vld [vmem:[#allocation7 + $0x24] ss:$8 sps:$4 sm:$0xff]   ;;  %v1572_v12 = vld [vmem:[#allocation7 + $0x20] ss:$8 sps:$4 sm:$0xff]   ;;  %v1573_v13 = vld [vmem:[#allocation7 + $0x14] ss:$8 sps:$4 sm:$0xff]  }
  0x42   :  { %v1575_v14 = vld [vmem:[#allocation7 + $0x10] ss:$8 sps:$4 sm:$0xff]   ;;  %v1576_v15 = vld [vmem:[#allocation7 + $0x4] ss:$8 sps:$4 sm:$0xff]   ;;  %v1578_v16 = vld [vmem:[#allocation7] ss:$8 sps:$4 sm:$0xff]  }
  0x43   :  { %v1580_v18 = vld [vmem:[#allocation5 + $0x8] sm:$0xff]   ;;  %v1581_v19 = vld [vmem:[#allocation5 + $0x10] sm:$0xff]   ;;  %v1582_v20 = vld [vmem:[#allocation5 + $0x18] sm:$0xff]  }
  0x44   :  { %262 = vmatpush1.bf16.msra.mxu0 %v1560_v4  ;;  %v1583_v21 = vld [vmem:[#allocation5 + $0x20] sm:$0xff]   ;;  %v1584_v22 = vld [vmem:[#allocation5 + $0x28] sm:$0xff]   ;;  %v1585_v23 = vld [vmem:[#allocation5 + $0x30] sm:$0xff]  }
  0x45   :  { %263 = vmatprep.subr.bf16.mxu0 %v1561_v5  ;;  %v1586_v24 = vld [vmem:[#allocation5 + $0x38] sm:$0xff]   ;;  %v1597_v44 = vld [vmem:[#allocation8 + $0x70] sm:$0xff]   ;;  %v1599_v48 = vld [vmem:[#allocation8 + $0x68] sm:$0xff]  }
  0x46   :  { %v1595_v42 = vld [vmem:[#allocation8 + $0x78] sm:$0xff]   ;;  %v1598_v47 = vld [vmem:[#allocation8 + $0x30] sm:$0xff]   ;;  %v1600_v51 = vld [vmem:[#allocation8 + $0x28] sm:$0xff]  }
  0x47   :  { %v1596_v43 = vld [vmem:[#allocation8 + $0x38] sm:$0xff]   ;;  %v1601_v52 = vld [vmem:[#allocation8 + $0x60] sm:$0xff]  }
  0x48   :  { %264 = vmatpush1.bf16.msra.mxu0 %v1563_v6  ;;  %v1602_v55 = vld [vmem:[#allocation8 + $0x20] sm:$0xff]   ;;  %v1603_v56 = vld [vmem:[#allocation8 + $0x58] sm:$0xff]  }
  0x49   :  { %265 = vmatprep.subr.bf16.mxu0 %v1564_v7  ;;  %v1604_v59 = vld [vmem:[#allocation8 + $0x18] sm:$0xff]  }
  0x4c   :  { %266 = vmatpush1.bf16.msra.mxu0 %v1566_v8 }
  0x4d   :  { %267 = vmatprep.subr.bf16.mxu0 %v1567_v9 }
  0x50   :  { %268 = vmatpush1.bf16.msra.mxu0 %v1569_v10 }
  0x51   :  { %269 = vmatprep.subr.bf16.mxu0 %v1570_v11 }
  0x54   :  { %270 = vmatpush1.bf16.msra.mxu0 %v1572_v12 }
  0x55   :  { %271 = vmatprep.subr.bf16.mxu0 %v1573_v13 }
  0x58   :  { %272 = vmatpush1.bf16.msra.mxu0 %v1575_v14 }
  0x59   :  { %273 = vmatprep.subr.bf16.mxu0 %v1576_v15 }
  0x5c   :  { %274 = vmatpush1.bf16.msra.mxu0 %v1578_v16 }
  0x5d   :  { %1320 = vmatprep.subr.bf16.mxu0 %v1595_v42 }
  0x5f   :  { %292 = vmatmul.mubr.bf16.vlgmr.msra.gmra.mxu0 %v1579_v17 }
  0x60   :  { %301 = vmatprep.mubr.bf16.mxu0 %v1756_v0  ;;  %1321 = vmatpush3.bf16.msra.mxu0 %v1596_v43 }
  0x61   :  { %1322 = vmatprep.subr.bf16.mxu0 %v1597_v44 }
  0x64   :  { %1323 = vmatpush3.bf16.msra.mxu0 %v1598_v47 }
  0x65   :  { %1324 = vmatprep.subr.bf16.mxu0 %v1599_v48 }
  0x67   :  { %302 = vmatmul.mubr.bf16.gmra.mxu0 %v1580_v18 }
  0x68   :  { %311 = vmatprep.mubr.bf16.mxu0 %v1756_v0  ;;  %1325 = vmatpush3.bf16.msra.mxu0 %v1600_v51 }
  0x69   :  { %1326 = vmatprep.subr.bf16.mxu0 %v1601_v52 }
  0x6c   :  { %1327 = vmatpush3.bf16.msra.mxu0 %v1602_v55 }
  0x6d   :  { %1328 = vmatprep.subr.bf16.mxu0 %v1603_v56 }
  0x6f   :  { %312 = vmatmul.mubr.bf16.gmra.mxu0 %v1581_v19 }
  0x70   :  { %321 = vmatprep.mubr.bf16.mxu0 %v1756_v0  ;;  %1329 = vmatpush3.bf16.msra.mxu0 %v1604_v59 }
  0x77   :  { %322 = vmatmul.mubr.bf16.gmra.mxu0 %v1582_v20  ;;  %v1884_v20 = vld [vmem:[#allocation2] sm:$0xff]  }
  0x78   :  { %331 = vmatprep.mubr.bf16.mxu0 %v1756_v0 }
  0x7f   :  { %332 = vmatmul.mubr.bf16.gmra.mxu0 %v1583_v21  ;;  %v1891_v21 = vld [vmem:[#allocation2 + $0x8] sm:$0xff]  }
  0x80   :  { %341 = vmatprep.mubr.bf16.mxu0 %v1756_v0 }
  0x87   :  { %342 = vmatmul.mubr.bf16.gmra.mxu0 %v1584_v22  ;;  %v1895_v22 = vld [vmem:[#allocation2 + $0x10] sm:$0xff]  }
  0x88   :  { %351 = vmatprep.mubr.bf16.mxu0 %v1756_v0 }
  0x8f   :  { %352 = vmatmul.mubr.bf16.gmra.mxu0 %v1585_v23  ;;  %v1899_v23 = vld [vmem:[#allocation2 + $0x18] sm:$0xff]  }
  0x90   :  { %361 = vmatprep.mubr.bf16.mxu0 %v1756_v0 }
  0x97   :  { %362 = vmatmul.mubr.bf16.gmra.mxu0 %v1586_v24  ;;  %v1903_v24 = vld [vmem:[#allocation2 + $0x20] sm:$0xff]  }
 0x11f   :  { %v1842_v25 = vpop.f32.mrf.mxu0 }
 0x121   :  { %v1844_v26 = vpop.f32.mrf.mxu0 }
 0x123   :  { %v1846_v27 = vpop.f32.mrf.mxu0 }
 0x124   :  { %v388_v28 = vpack.c.bf16 %v1846_v27, %v1842_v25  ;;  %v1907_v25 = vld [vmem:[#allocation2 + $0x28] sm:$0xff]   ;;  %v1915_v27 = vld [vmem:[#allocation2 + $0x38] sm:$0xff]  }
 0x125   :  { %v1850_v29 = vpop.f32.mrf.mxu0 }
 0x126   :  { %v389_v30 = vpack.c.bf16 %v1850_v29, %v1844_v26  ;;  %v1911_v26 = vld [vmem:[#allocation2 + $0x30] sm:$0xff]  }
 0x127   :  { %v1854_v31 = vpop.f32.mrf.mxu0  ;;  %v1606_v29 = vld [vmem:[#allocation8 + $0x10] sm:$0xff]  }
 0x129   :  { %v1856_v32 = vpop.f32.mrf.mxu0 }
 0x12b   :  { %v1858_v33 = vpop.f32.mrf.mxu0 }
 0x12c   :  { %v390_v34 = vpack.c.bf16 %v1858_v33, %v1854_v31  ;;  %v1608_v31 = vld [vmem:[#allocation8 + $0x8] sm:$0xff]   ;;  %v1610_v33 = vld [vmem:[#allocation8] sm:$0xff]  }
 0x12d   :  { %v1862_v35 = vpop.f32.mrf.mxu0 }
 0x12e   :  { %v391_v36 = vpack.c.bf16 %v1862_v35, %v1856_v32  ;;  %v1609_v32 = vld [vmem:[#allocation8 + $0x40] sm:$0xff]  }
 0x12f   :  { %v1866_v37 = vpop.f32.mrf.mxu0 }
 0x131   :  { %v1868_v38 = vpop.f32.mrf.mxu0 }
 0x133   :  { %v1870_v39 = vpop.f32.mrf.mxu0 }
 0x134   :  { %v392_v19 = vpack.c.bf16 %v1870_v39, %v1866_v37 }
 0x135   :  { %v319_v40 = vpop.f32.mrf.mxu0 }
 0x136   :  { %v393_v18 = vpack.c.bf16 %v319_v40, %v1868_v38  ;;  %v404_v38 = vld [vmem:[%s1992_s3] sm:$0x3] }
 0x137   :  { %v323_v41 = vpop.f32.mrf.mxu0 }
 0x139   :  { %v325_v45 = vpop.f32.mrf.mxu0 }
 0x13b   :  { %v327_v46 = vpop.f32.mrf.mxu0 }
 0x13c   :  { %v394_v17 = vpack.c.bf16 %v327_v46, %v323_v41 }
 0x13d   :  { %v329_v49 = vpop.f32.mrf.mxu0 }
 0x13e   :  { %v395_v16 = vpack.c.bf16 %v329_v49, %v325_v45 }
 0x13f   :  { %v333_v50 = vpop.f32.mrf.mxu0 }
 0x141   :  { %v335_v53 = vpop.f32.mrf.mxu0 }
 0x143   :  { %v337_v54 = vpop.f32.mrf.mxu0 }
 0x144   :  { %v396_v15 = vpack.c.bf16 %v337_v54, %v333_v50 }
 0x145   :  { %v339_v57 = vpop.f32.mrf.mxu0 }
 0x146   :  { %v397_v14 = vpack.c.bf16 %v339_v57, %v335_v53 }
 0x147   :  { %v343_v58 = vpop.f32.mrf.mxu0 }
 0x149   :  { %v345_v60 = vpop.f32.mrf.mxu0 }
 0x14b   :  { %v347_v61 = vpop.f32.mrf.mxu0 }
 0x14c   :  { %v398_v13 = vpack.c.bf16 %v347_v61, %v343_v58 }
 0x14d   :  { %v349_v62 = vpop.f32.mrf.mxu0 }
 0x14e   :  { %v399_v12 = vpack.c.bf16 %v349_v62, %v345_v60 }
 0x14f   :  { %v353_v63 = vpop.f32.mrf.mxu0 }
 0x151   :  { %v355_v1 = vpop.f32.mrf.mxu0 }
 0x153   :  { %v357_v2 = vpop.f32.mrf.mxu0 }
 0x154   :  { %v400_v11 = vpack.c.bf16 %v357_v2, %v353_v63 }
 0x155   :  { %v359_v3 = vpop.f32.mrf.mxu0 }
 0x156   :  { %v401_v10 = vpack.c.bf16 %v359_v3, %v355_v1 }
 0x157   :  { %v363_v4 = vpop.f32.mrf.mxu0 }
 0x159   :  { %v365_v5 = vpop.f32.mrf.mxu0 }
 0x15b   :  { %v367_v6 = vpop.f32.mrf.mxu0 }
 0x15c   :  { %v402_v9 = vpack.c.bf16 %v367_v6, %v363_v4 }
 0x15d   :  { %v369_v7 = vpop.f32.mrf.mxu0 }
 0x15e   :  { %v403_v8 = vpack.c.bf16 %v369_v7, %v365_v5 }
 0x160   :  { %464 = vmatprep.subr.bf16.mxu1 %v403_v8 }
 0x161   :  { %465 = vmatpush1.bf16.msra.mxu1 %v402_v9 }
 0x162   :  { %466 = vmatprep.subr.bf16.mxu1 %v401_v10 }
 0x165   :  { %467 = vmatpush1.bf16.msra.mxu1 %v400_v11 }
 0x166   :  { %468 = vmatprep.subr.bf16.mxu1 %v399_v12 }
 0x169   :  { %469 = vmatpush1.bf16.msra.mxu1 %v398_v13 }
 0x16a   :  { %470 = vmatprep.subr.bf16.mxu1 %v397_v14 }
 0x16d   :  { %471 = vmatpush1.bf16.msra.mxu1 %v396_v15 }
 0x16e   :  { %472 = vmatprep.subr.bf16.mxu1 %v395_v16 }
 0x171   :  { %473 = vmatpush1.bf16.msra.mxu1 %v394_v17 }
 0x172   :  { %474 = vmatprep.subr.bf16.mxu1 %v393_v18 }
 0x175   :  { %475 = vmatpush1.bf16.msra.mxu1 %v392_v19 }
 0x176   :  { %476 = vmatprep.subr.bf16.mxu1 %v391_v36 }
 0x179   :  { %477 = vmatpush1.bf16.msra.mxu1 %v390_v34  ;;  %v406_v34 = vlaneseq }
 0x17a   :  { %478 = vmatprep.subr.bf16.mxu1 %v389_v30  ;;  %v1607_v30 = vld [vmem:[#allocation8 + $0x48] sm:$0xff]  }
 0x17d   :  { %479 = vmatpush1.bf16.msra.mxu1 %v388_v28  ;;  %v1605_v28 = vld [vmem:[#allocation8 + $0x50] sm:$0xff]  }
 0x17e   :  { %1330 = vmatprep.subr.bf16.mxu0 %v1605_v28 }
 0x17f   :  { %1331 = vmatpush3.bf16.msra.mxu0 %v1606_v29 }
 0x180   :  { %497 = vmatmul.mubr.bf16.vlgmr.msra.gmra.mxu1 %v1884_v20  ;;  %1332 = vmatprep.subr.bf16.mxu0 %v1607_v30 }
 0x181   :  { %506 = vmatprep.mubr.bf16.mxu1 %v1756_v0 }
 0x183   :  { %1333 = vmatpush3.bf16.msra.mxu0 %v1608_v31 }
 0x184   :  { %1334 = vmatprep.subr.bf16.mxu0 %v1609_v32 }
 0x187   :  { %1335 = vmatpush3.bf16.msra.mxu0 %v1610_v33 }
 0x188   :  { %507 = vmatmul.mubr.bf16.gmra.mxu1 %v1891_v21 }
 0x189   :  { %516 = vmatprep.mubr.bf16.mxu1 %v1756_v0 }
 0x190   :  { %517 = vmatmul.mubr.bf16.gmra.mxu1 %v1895_v22 }
 0x191   :  { %526 = vmatprep.mubr.bf16.mxu1 %v1756_v0 }
 0x198   :  { %527 = vmatmul.mubr.bf16.gmra.mxu1 %v1899_v23 }
 0x199   :  { %536 = vmatprep.mubr.bf16.mxu1 %v1756_v0 }
 0x1a0   :  { %537 = vmatmul.mubr.bf16.gmra.mxu1 %v1903_v24 }
 0x1a1   :  { %546 = vmatprep.mubr.bf16.mxu1 %v1756_v0 }
 0x1a8   :  { %547 = vmatmul.mubr.bf16.gmra.mxu1 %v1907_v25 }
 0x1a9   :  { %556 = vmatprep.mubr.bf16.mxu1 %v1756_v0 }
 0x1b0   :  { %557 = vmatmul.mubr.bf16.gmra.mxu1 %v1911_v26 }
 0x1b1   :  { %566 = vmatprep.mubr.bf16.mxu1 %v1756_v0  ;;  %v407_v0 = vshrl.u32 %v406_v34, 7 }
 0x1b3   :  { %v412_v35 = vsub.s32 1, %v407_v0  ;;  %v408_v36 = vsub.s32 0, %v407_v0 }
 0x1b5   :  { %v1922_v40 = vrot.slane %v404_v38, %v412_v35  ;;  %v1924_v41 = vrot.slane %v404_v38, %v408_v36 }
 0x1b8   :  { %567 = vmatmul.mubr.bf16.gmra.mxu1 %v1915_v27 }
 0x1b9   :  { %1448 = vmatprep.mubr.bf16.mxu1 %v1884_v20 }
 0x240   :  { %v498_v37 = vpop.f32.mrf.mxu1 }
 0x241   :  { %v499_v47 = vadd.f32 %v498_v37, %v1924_v41 }
 0x242   :  { %v500_v39 = vpop.f32.mrf.mxu1 }
 0x243   :  { %v501_v45 = vadd.f32 %v500_v39, %v1922_v40 }
 0x244   :  { %v502_v42 = vpop.f32.mrf.mxu1 }
 0x245   :  { %v503_v43 = vadd.f32 %v502_v42, %v1924_v41 }
 0x246   :  { %v504_v44 = vpop.f32.mrf.mxu1 }
 0x247   :  { %v505_v46 = vadd.f32 %v504_v44, %v1922_v40  ;;  %v577_v50 = vpack.c.bf16 %v503_v43, %v499_v47 }
 0x248   :  { %v508_v48 = vpop.f32.mrf.mxu1 }
 0x249   :  { %v578_v49 = vpack.c.bf16 %v505_v46, %v501_v45  ;;  %v509_v57 = vadd.f32 %v508_v48, %v1924_v41 }
 0x24a   :  { %v510_v51 = vpop.f32.mrf.mxu1 }
 0x24b   :  { %753 = vmatprep.mubr.bf16.mxu0 %v578_v49  ;;  %v511_v55 = vadd.f32 %v510_v51, %v1922_v40 }
 0x24c   :  { %v512_v52 = vpop.f32.mrf.mxu1  ;;  %754 = vmatmul.mubr.bf16.vlgmr.msra.gmra.mxu0 %v577_v50 }
 0x24d   :  { %v513_v53 = vadd.f32 %v512_v52, %v1924_v41 }
 0x24e   :  { %v514_v54 = vpop.f32.mrf.mxu1 }
 0x24f   :  { %v515_v56 = vadd.f32 %v514_v54, %v1922_v40  ;;  %v579_v60 = vpack.c.bf16 %v513_v53, %v509_v57 }
 0x250   :  { %v518_v58 = vpop.f32.mrf.mxu1 }
 0x251   :  { %v580_v59 = vpack.c.bf16 %v515_v56, %v511_v55  ;;  %v519_v4 = vadd.f32 %v518_v58, %v1924_v41 }
 0x252   :  { %v520_v61 = vpop.f32.mrf.mxu1 }
 0x253   :  { %761 = vmatprep.mubr.bf16.mxu0 %v580_v59  ;;  %v521_v2 = vadd.f32 %v520_v61, %v1922_v40 }
 0x254   :  { %v522_v62 = vpop.f32.mrf.mxu1  ;;  %762 = vmatmul.mubr.bf16.gmra.mxu0 %v579_v60 }
 0x255   :  { %v523_v63 = vadd.f32 %v522_v62, %v1924_v41 }
 0x256   :  { %v524_v1 = vpop.f32.mrf.mxu1 }
 0x257   :  { %v525_v3 = vadd.f32 %v524_v1, %v1922_v40  ;;  %v581_v7 = vpack.c.bf16 %v523_v63, %v519_v4 }
 0x258   :  { %v528_v5 = vpop.f32.mrf.mxu1 }
 0x259   :  { %v582_v6 = vpack.c.bf16 %v525_v3, %v521_v2  ;;  %v529_v14 = vadd.f32 %v528_v5, %v1924_v41 }
 0x25a   :  { %v530_v8 = vpop.f32.mrf.mxu1 }
 0x25b   :  { %769 = vmatprep.mubr.bf16.mxu0 %v582_v6  ;;  %v531_v12 = vadd.f32 %v530_v8, %v1922_v40 }
 0x25c   :  { %v532_v9 = vpop.f32.mrf.mxu1  ;;  %770 = vmatmul.mubr.bf16.gmra.mxu0 %v581_v7 }
 0x25d   :  { %v533_v10 = vadd.f32 %v532_v9, %v1924_v41 }
 0x25e   :  { %v534_v11 = vpop.f32.mrf.mxu1 }
 0x25f   :  { %v535_v13 = vadd.f32 %v534_v11, %v1922_v40  ;;  %v583_v17 = vpack.c.bf16 %v533_v10, %v529_v14 }
 0x260   :  { %v538_v15 = vpop.f32.mrf.mxu1 }
 0x261   :  { %v584_v16 = vpack.c.bf16 %v535_v13, %v531_v12  ;;  %v539_v32 = vadd.f32 %v538_v15, %v1924_v41 }
 0x262   :  { %v540_v18 = vpop.f32.mrf.mxu1 }
 0x263   :  { %777 = vmatprep.mubr.bf16.mxu0 %v584_v16  ;;  %v541_v30 = vadd.f32 %v540_v18, %v1922_v40 }
 0x264   :  { %v542_v19 = vpop.f32.mrf.mxu1  ;;  %778 = vmatmul.mubr.bf16.gmra.mxu0 %v583_v17 }
 0x265   :  { %v543_v28 = vadd.f32 %v542_v19, %v1924_v41 }
 0x266   :  { %v544_v29 = vpop.f32.mrf.mxu1 }
 0x267   :  { %v545_v31 = vadd.f32 %v544_v29, %v1922_v40  ;;  %v585_v0 = vpack.c.bf16 %v543_v28, %v539_v32 }
 0x268   :  { %v548_v33 = vpop.f32.mrf.mxu1 }
 0x269   :  { %v586_v34 = vpack.c.bf16 %v545_v31, %v541_v30  ;;  %v549_v43 = vadd.f32 %v548_v33, %v1924_v41 }
 0x26a   :  { %v550_v35 = vpop.f32.mrf.mxu1 }
 0x26b   :  { %785 = vmatprep.mubr.bf16.mxu0 %v586_v34  ;;  %v551_v39 = vadd.f32 %v550_v35, %v1922_v40 }
 0x26c   :  { %v552_v36 = vpop.f32.mrf.mxu1  ;;  %786 = vmatmul.mubr.bf16.gmra.mxu0 %v585_v0 }
 0x26d   :  { %v553_v37 = vadd.f32 %v552_v36, %v1924_v41 }
 0x26e   :  { %v554_v38 = vpop.f32.mrf.mxu1 }
 0x26f   :  { %v555_v42 = vadd.f32 %v554_v38, %v1922_v40  ;;  %v587_v46 = vpack.c.bf16 %v553_v37, %v549_v43 }
 0x270   :  { %v558_v44 = vpop.f32.mrf.mxu1 }
 0x271   :  { %v588_v45 = vpack.c.bf16 %v555_v42, %v551_v39  ;;  %v559_v53 = vadd.f32 %v558_v44, %v1924_v41 }
 0x272   :  { %v560_v47 = vpop.f32.mrf.mxu1 }
 0x273   :  { %793 = vmatprep.mubr.bf16.mxu0 %v588_v45  ;;  %v561_v51 = vadd.f32 %v560_v47, %v1922_v40 }
 0x274   :  { %v562_v48 = vpop.f32.mrf.mxu1  ;;  %794 = vmatmul.mubr.bf16.gmra.mxu0 %v587_v46 }
 0x275   :  { %v563_v49 = vadd.f32 %v562_v48, %v1924_v41 }
 0x276   :  { %v564_v50 = vpop.f32.mrf.mxu1 }
 0x277   :  { %v565_v52 = vadd.f32 %v564_v50, %v1922_v40  ;;  %v589_v56 = vpack.c.bf16 %v563_v49, %v559_v53 }
 0x278   :  { %v568_v54 = vpop.f32.mrf.mxu1 }
 0x279   :  { %v590_v55 = vpack.c.bf16 %v565_v52, %v561_v51  ;;  %v569_v63 = vadd.f32 %v568_v54, %v1924_v41 }
 0x27a   :  { %v570_v57 = vpop.f32.mrf.mxu1 }
 0x27b   :  { %801 = vmatprep.mubr.bf16.mxu0 %v590_v55  ;;  %v571_v61 = vadd.f32 %v570_v57, %v1922_v40 }
 0x27c   :  { %v572_v58 = vpop.f32.mrf.mxu1  ;;  %802 = vmatmul.mubr.bf16.gmra.mxu0 %v589_v56 }
 0x27d   :  { %v573_v59 = vadd.f32 %v572_v58, %v1924_v41 }
 0x27e   :  { %v574_v60 = vpop.f32.mrf.mxu1 }
 0x27f   :  { %v575_v62 = vadd.f32 %v574_v60, %v1922_v40  ;;  %v591_v2 = vpack.c.bf16 %v573_v59, %v569_v63 }
 0x281   :  { %v592_v1 = vpack.c.bf16 %v575_v62, %v571_v61 }
 0x283   :  { %809 = vmatprep.mubr.bf16.mxu0 %v592_v1 }
 0x284   :  { %810 = vmatmul.mubr.bf16.gmra.mxu0 %v591_v2  ;;  %v1611_v2 = vld [vmem:[#allocation10 + $0x38] sm:$0xff]  }
 0x285   :  { %1512 = vmatprep.mubr.bf16.mxu0 %v1884_v20 }
 0x30c   :  { %v1336_v3 = vpop.f32.mrf.mxu0 }
 0x30e   :  { %v1337_v4 = vpop.f32.mrf.mxu0 }
 0x30f   :  { %v1338_v5 = vadd.f32 %v1337_v4, %v1336_v3  ;;  %v1612_v3 = vld [vmem:[#allocation10 + $0x30] sm:$0xff]   ;;  %v1613_v4 = vld [vmem:[#allocation10 + $0x28] sm:$0xff]  }
 0x310   :  { %v1339_v6 = vpop.f32.mrf.mxu0 }
 0x312   :  { %v1340_v7 = vpop.f32.mrf.mxu0 }
 0x313   :  { %v1341_v8 = vadd.f32 %v1340_v7, %v1339_v6  ;;  %v1615_v6 = vld [vmem:[#allocation10 + $0x18] sm:$0xff]   ;;  %v1616_v7 = vld [vmem:[#allocation10 + $0x10] sm:$0xff]  }
 0x314   :  { %v1342_v9 = vpop.f32.mrf.mxu0 }
 0x315   :  { %v1959_v10 = vpack.c.bf16 %v1341_v8, %v1338_v5  ;;  %v1614_v5 = vld [vmem:[#allocation10 + $0x20] sm:$0xff]   ;;  %v1617_v8 = vld [vmem:[#allocation10 + $0x8] sm:$0xff]  }
 0x316   :  { %v1343_v11 = vpop.f32.mrf.mxu0 }
 0x317   :  { %v1344_v12 = vadd.f32 %v1343_v11, %v1342_v9  ;;  %v1618_v9 = vld [vmem:[#allocation10] sm:$0xff]  }
 0x318   :  { %v1345_v40 = vpop.f32.mrf.mxu0 }
 0x31a   :  { %v1346_v13 = vpop.f32.mrf.mxu0 }
 0x31b   :  { %v1347_v41 = vadd.f32 %v1346_v13, %v1345_v40 }
 0x31c   :  { %v1348_v14 = vpop.f32.mrf.mxu0 }
 0x31d   :  { %v819_v15 = vpack.c.bf16 %v1347_v41, %v1344_v12  ;;  %v1310_v12 = vld [vmem:[%s1994_s5] ss:$0 sm:$0xff] }
 0x31e   :  { %v1349_v16 = vpop.f32.mrf.mxu0 }
 0x31f   :  { %v1350_v63 = vadd.f32 %v1349_v16, %v1348_v14 }
 0x320   :  { %v1351_v17 = vpop.f32.mrf.mxu0 }
 0x322   :  { %v1352_v18 = vpop.f32.mrf.mxu0 }
 0x323   :  { %v1353_v61 = vadd.f32 %v1352_v18, %v1351_v17 }
 0x324   :  { %v1354_v20 = vpop.f32.mrf.mxu0 }
 0x325   :  { %v820_v1 = vpack.c.bf16 %v1353_v61, %v1350_v63 }
 0x326   :  { %v1355_v19 = vpop.f32.mrf.mxu0 }
 0x327   :  { %v1356_v60 = vadd.f32 %v1355_v19, %v1354_v20 }
 0x328   :  { %v1357_v28 = vpop.f32.mrf.mxu0 }
 0x32a   :  { %v1358_v29 = vpop.f32.mrf.mxu0 }
 0x32b   :  { %v1359_v58 = vadd.f32 %v1358_v29, %v1357_v28 }
 0x32c   :  { %v1360_v30 = vpop.f32.mrf.mxu0 }
 0x32d   :  { %v821_v62 = vpack.c.bf16 %v1359_v58, %v1356_v60 }
 0x32e   :  { %v1361_v31 = vpop.f32.mrf.mxu0 }
 0x32f   :  { %v1362_v57 = vadd.f32 %v1361_v31, %v1360_v30 }
 0x330   :  { %v1363_v32 = vpop.f32.mrf.mxu0 }
 0x332   :  { %v1364_v33 = vpop.f32.mrf.mxu0 }
 0x333   :  { %v1365_v55 = vadd.f32 %v1364_v33, %v1363_v32 }
 0x334   :  { %v1366_v34 = vpop.f32.mrf.mxu0 }
 0x335   :  { %v822_v59 = vpack.c.bf16 %v1365_v55, %v1362_v57 }
 0x336   :  { %v1367_v0 = vpop.f32.mrf.mxu0 }
 0x337   :  { %v1368_v54 = vadd.f32 %v1367_v0, %v1366_v34 }
 0x338   :  { %v1369_v35 = vpop.f32.mrf.mxu0 }
 0x33a   :  { %v1370_v36 = vpop.f32.mrf.mxu0 }
 0x33b   :  { %v1371_v52 = vadd.f32 %v1370_v36, %v1369_v35 }
 0x33c   :  { %v1372_v37 = vpop.f32.mrf.mxu0 }
 0x33d   :  { %v823_v56 = vpack.c.bf16 %v1371_v52, %v1368_v54 }
 0x33e   :  { %v1373_v38 = vpop.f32.mrf.mxu0 }
 0x33f   :  { %v1374_v50 = vadd.f32 %v1373_v38, %v1372_v37 }
 0x340   :  { %v1375_v39 = vpop.f32.mrf.mxu0 }
 0x342   :  { %v1376_v42 = vpop.f32.mrf.mxu0 }
 0x343   :  { %v1377_v47 = vadd.f32 %v1376_v42, %v1375_v39 }
 0x344   :  { %v1378_v43 = vpop.f32.mrf.mxu0 }
 0x345   :  { %v824_v53 = vpack.c.bf16 %v1377_v47, %v1374_v50 }
 0x346   :  { %v1379_v44 = vpop.f32.mrf.mxu0 }
 0x347   :  { %v1380_v48 = vadd.f32 %v1379_v44, %v1378_v43 }
 0x348   :  { %v1381_v45 = vpop.f32.mrf.mxu0 }
 0x34a   :  { %v1382_v46 = vpop.f32.mrf.mxu0 }
 0x34b   :  { %v1383_v49 = vadd.f32 %v1382_v46, %v1381_v45 }
 0x34d   :  { %v825_v51 = vpack.c.bf16 %v1383_v49, %v1380_v48 }
 0x34f   :  { %1432 = vmatprep.subr.bf16.mxu1 %v825_v51 }
 0x350   :  { %1433 = vmatpush3.bf16.msra.mxu1 %v825_v51 }
 0x351   :  { %1434 = vmatprep.subr.bf16.mxu1 %v824_v53 }
 0x354   :  { %1435 = vmatpush3.bf16.msra.mxu1 %v824_v53 }
 0x355   :  { %1436 = vmatprep.subr.bf16.mxu1 %v823_v56 }
 0x358   :  { %1437 = vmatpush3.bf16.msra.mxu1 %v823_v56 }
 0x359   :  { %1438 = vmatprep.subr.bf16.mxu1 %v822_v59 }
 0x35c   :  { %1439 = vmatpush3.bf16.msra.mxu1 %v822_v59 }
 0x35d   :  { %1440 = vmatprep.subr.bf16.mxu1 %v821_v62 }
 0x360   :  { %1441 = vmatpush3.bf16.msra.mxu1 %v821_v62 }
 0x361   :  { %1442 = vmatprep.subr.bf16.mxu1 %v820_v1 }
 0x364   :  { %1443 = vmatpush3.bf16.msra.mxu1 %v820_v1 }
 0x365   :  { %1444 = vmatprep.subr.bf16.mxu1 %v819_v15 }
 0x368   :  { %1445 = vmatpush3.bf16.msra.mxu1 %v819_v15 }
 0x369   :  { %1446 = vmatprep.subr.bf16.mxu1 %v1959_v10 }
 0x36c   :  { %1447 = vmatpush3.bf16.msra.mxu1 %v1959_v10 }
 0x36d   :  { %1464 = vmatprep.subr.bf16.mxu1 %v1611_v2 }
 0x36f   :  { %1449 = vmatmul.mubr.bf16.vlgmr.msra.gmra.mxu1 %v1891_v21 }
 0x370   :  { %1452 = vmatprep.mubr.bf16.mxu1 %v1895_v22  ;;  %1465 = vmatpush3.bf16.msra.mxu1 %v1611_v2 }
 0x371   :  { %1466 = vmatprep.subr.bf16.mxu1 %v1612_v3 }
 0x374   :  { %1467 = vmatpush3.bf16.msra.mxu1 %v1612_v3 }
 0x375   :  { %1468 = vmatprep.subr.bf16.mxu1 %v1613_v4 }
 0x377   :  { %1453 = vmatmul.mubr.bf16.gmra.mxu1 %v1899_v23 }
 0x378   :  { %1456 = vmatprep.mubr.bf16.mxu1 %v1903_v24  ;;  %1469 = vmatpush3.bf16.msra.mxu1 %v1613_v4 }
 0x379   :  { %1470 = vmatprep.subr.bf16.mxu1 %v1614_v5 }
 0x37c   :  { %1471 = vmatpush3.bf16.msra.mxu1 %v1614_v5 }
 0x37d   :  { %1472 = vmatprep.subr.bf16.mxu1 %v1615_v6 }
 0x37f   :  { %1457 = vmatmul.mubr.bf16.gmra.mxu1 %v1907_v25 }
 0x380   :  { %1460 = vmatprep.mubr.bf16.mxu1 %v1911_v26  ;;  %1473 = vmatpush3.bf16.msra.mxu1 %v1615_v6 }
 0x381   :  { %1474 = vmatprep.subr.bf16.mxu1 %v1616_v7 }
 0x384   :  { %1475 = vmatpush3.bf16.msra.mxu1 %v1616_v7 }
 0x385   :  { %1476 = vmatprep.subr.bf16.mxu1 %v1617_v8 }
 0x387   :  { %1461 = vmatmul.mubr.bf16.gmra.mxu1 %v1915_v27 }
 0x388   :  { %1477 = vmatpush3.bf16.msra.mxu1 %v1617_v8 }
 0x389   :  { %1478 = vmatprep.subr.bf16.mxu1 %v1618_v9 }
 0x38c   :  { %1479 = vmatpush3.bf16.msra.mxu1 %v1618_v9 }
 0x42f   :  { %v1450_v10 = vpop.f32.mrf.mxu1 }
 0x430   :  { %v876_v14 = vadd.f32 %v1450_v10, %v1310_v12 }
 0x431   :  { %v867_v11 = vpop.f32.mrf.mxu1 }
 0x432   :  { %v868_v13 = vadd.f32 %v1310_v12, %v867_v11  ;;  %v932_v28 = vmax.f32 %v876_v14, 0.0 }
 0x433   :  { %v1451_v40 = vpop.f32.mrf.mxu1 }
 0x434   :  { %v879_v41 = vadd.f32 %v1451_v40, %v1310_v12  ;;  %v930_v20 = vmax.f32 %v868_v13, 0.0 }
 0x435   :  { %v870_v15 = vpop.f32.mrf.mxu1 }
 0x436   :  { %v871_v16 = vadd.f32 %v1310_v12, %v870_v15  ;;  %v933_v17 = vmax.f32 %v879_v41, 0.0 }
 0x437   :  { %v1454_v18 = vpop.f32.mrf.mxu1 }
 0x438   :  { %v931_v19 = vmax.f32 %v871_v16, 0.0  ;;  %v947_v31 = vpack.c.bf16 %v933_v17, %v932_v28  ;;  %v892_v0 = vadd.f32 %v1454_v18, %v1310_v12 }
 0x439   :  { %v883_v29 = vpop.f32.mrf.mxu1 }
 0x43a   :  { %v946_v30 = vpack.c.bf16 %v931_v19, %v930_v20  ;;  %v884_v33 = vadd.f32 %v1310_v12, %v883_v29  ;;  %v936_v43 = vmax.f32 %v892_v0, 0.0 }
 0x43b   :  { %v1455_v32 = vpop.f32.mrf.mxu1 }
 0x43c   :  { %v895_v34 = vadd.f32 %v1455_v32, %v1310_v12  ;;  %1480 = vmatprep.mubr.bf16.mxu1 %v946_v30  ;;  %v934_v39 = vmax.f32 %v884_v33, 0.0 }
 0x43d   :  { %v886_v35 = vpop.f32.mrf.mxu1  ;;  %1481 = vmatmul.mubr.bf16.vlgmr.msra.gmra.mxu1 %v947_v31 }
 0x43e   :  { %v887_v36 = vadd.f32 %v1310_v12, %v886_v35  ;;  %v937_v37 = vmax.f32 %v895_v34, 0.0 }
 0x43f   :  { %v1458_v38 = vpop.f32.mrf.mxu1 }
 0x440   :  { %v935_v42 = vmax.f32 %v887_v36, 0.0  ;;  %v949_v46 = vpack.c.bf16 %v937_v37, %v936_v43  ;;  %v908_v50 = vadd.f32 %v1458_v38, %v1310_v12  ;;  %v1319_v37 = vld [vmem:[%s1996_s7] ss:$0 sm:$0xff]  ;;  %s1757_s7 = smov [#allocation11]  }
 0x441   :  { %v899_v44 = vpop.f32.mrf.mxu1  ;;  %s1248_s11 = sshll.u32 %s1757_s7, 4  ;;  %s1249_s11 = int_to_ptr.vmem [resolvable:$true] %s1248_s11 }
 0x442   :  { %v948_v45 = vpack.c.bf16 %v935_v42, %v934_v39  ;;  %v900_v48 = vadd.f32 %v1310_v12, %v899_v44  ;;  %v940_v57 = vmax.f32 %v908_v50, 0.0  ;;  %s1719_s12 = scalar_lea.vmem %s1249_s11, 2048  ;;  %p1724_p12 = scmp.lt.s32.totalorder %s1249_s11, %s1249_s11 }
 0x443   :  { %v1459_v47 = vpop.f32.mrf.mxu1  ;;  %p1720_p11 = scmp.ne.s32.totalorder %s1249_s11, %s1719_s12  ;;  %p1725_p13 = scmp.lt.s32.totalorder %s1719_s12, %s1719_s12 }
 0x444   :  { %v911_v49 = vadd.f32 %v1459_v47, %v1310_v12  ;;  %1484 = vmatprep.mubr.bf16.mxu1 %v948_v45  ;;  %v938_v55 = vmax.f32 %v900_v48, 0.0 }
 0x445   :  { %v902_v51 = vpop.f32.mrf.mxu1  ;;  %1485 = vmatmul.mubr.bf16.gmra.mxu1 %v949_v46  ;;  %p1726_p0 = por %p1725_p13, %p1724_p12 }
 0x446   :  { %v903_v52 = vadd.f32 %v1310_v12, %v902_v51  ;;  %v941_v53 = vmax.f32 %v911_v49, 0.0 }
 0x447   :  { %v1462_v54 = vpop.f32.mrf.mxu1  ;;  %p1727_p1 = pnand %p1726_p0, %p1720_p11 }
 0x448   :  { %v939_v56 = vmax.f32 %v903_v52, 0.0  ;;  %v951_v60 = vpack.c.bf16 %v941_v53, %v940_v57  ;;  %v924_v1 = vadd.f32 %v1462_v54, %v1310_v12 }
 0x449   :  { %v915_v58 = vpop.f32.mrf.mxu1 }
 0x44a   :  { %v950_v59 = vpack.c.bf16 %v939_v56, %v938_v55  ;;  %v916_v62 = vadd.f32 %v1310_v12, %v915_v58  ;;  %v944_v7 = vmax.f32 %v924_v1, 0.0 }
 0x44b   :  { %v1463_v61 = vpop.f32.mrf.mxu1 }
 0x44c   :  { %v927_v63 = vadd.f32 %v1463_v61, %v1310_v12  ;;  %1488 = vmatprep.mubr.bf16.mxu1 %v950_v59  ;;  %v942_v5 = vmax.f32 %v916_v62, 0.0 }
 0x44d   :  { %v918_v2 = vpop.f32.mrf.mxu1  ;;  %1489 = vmatmul.mubr.bf16.gmra.mxu1 %v951_v60 }
 0x44e   :  { %v919_v3 = vadd.f32 %v1310_v12, %v918_v2  ;;  %v945_v4 = vmax.f32 %v927_v63, 0.0 }
 0x450   :  { %v943_v6 = vmax.f32 %v919_v3, 0.0  ;;  %v953_v9 = vpack.c.bf16 %v945_v4, %v944_v7 }
 0x452   :  { %v952_v8 = vpack.c.bf16 %v943_v6, %v942_v5 }
 0x454   :  { %1492 = vmatprep.mubr.bf16.mxu1 %v952_v8 }
 0x455   :  { %1493 = vmatmul.mubr.bf16.gmra.mxu1 %v953_v9 }
 0x456   :  { %1520 = vmatprep.mubr.bf16.mxu1 %v1903_v24 }
 0x4fd   :  { %v1482_v10 = vpop.f32.mrf.mxu1 }
 0x4ff   :  { %v1052_v11 = vpop.f32.mrf.mxu1 }
 0x501   :  { %v1483_v40 = vpop.f32.mrf.mxu1 }
 0x502   :  { %v1116_v35 = vpack.c.bf16 %v1483_v40, %v1482_v10 }
 0x503   :  { %v1055_v13 = vpop.f32.mrf.mxu1 }
 0x504   :  { %v1115_v36 = vpack.c.bf16 %v1055_v13, %v1052_v11 }
 0x505   :  { %v1486_v41 = vpop.f32.mrf.mxu1 }
 0x507   :  { %v1068_v14 = vpop.f32.mrf.mxu1 }
 0x509   :  { %v1487_v15 = vpop.f32.mrf.mxu1 }
 0x50a   :  { %v1118_v34 = vpack.c.bf16 %v1487_v15, %v1486_v41 }
 0x50b   :  { %v1071_v16 = vpop.f32.mrf.mxu1 }
 0x50c   :  { %v1117_v0 = vpack.c.bf16 %v1071_v16, %v1068_v14 }
 0x50d   :  { %v1490_v17 = vpop.f32.mrf.mxu1 }
 0x50f   :  { %v1084_v12 = vpop.f32.mrf.mxu1 }
 0x511   :  { %v1491_v18 = vpop.f32.mrf.mxu1 }
 0x512   :  { %v1120_v24 = vpack.c.bf16 %v1491_v18, %v1490_v17 }
 0x513   :  { %v1087_v20 = vpop.f32.mrf.mxu1 }
 0x514   :  { %v1119_v33 = vpack.c.bf16 %v1087_v20, %v1084_v12 }
 0x515   :  { %v1494_v19 = vpop.f32.mrf.mxu1 }
 0x517   :  { %v1100_v28 = vpop.f32.mrf.mxu1 }
 0x519   :  { %v1495_v29 = vpop.f32.mrf.mxu1 }
 0x51a   :  { %v1122_v30 = vpack.c.bf16 %v1495_v29, %v1494_v19 }
 0x51b   :  { %v1103_v31 = vpop.f32.mrf.mxu1 }
 0x51c   :  { %v1121_v32 = vpack.c.bf16 %v1103_v31, %v1100_v28  ;;  %1496 = vmatprep.subr.bf16.mxu0 %v1122_v30  ;;  %1528 = vmatprep.subr.bf16.mxu1 %v1122_v30 }
 0x51d   :  { %1497 = vmatpush3.bf16.msra.mxu0 %v1122_v30  ;;  %1536 = vmatpush3.bf16.msra.mxu1 %v1122_v30 }
 0x51e   :  { %1498 = vmatprep.subr.bf16.mxu0 %v1121_v32  ;;  %1529 = vmatprep.subr.bf16.mxu1 %v1121_v32 }
 0x521   :  { %1499 = vmatpush3.bf16.msra.mxu0 %v1121_v32  ;;  %1537 = vmatpush3.bf16.msra.mxu1 %v1121_v32 }
 0x522   :  { %1500 = vmatprep.subr.bf16.mxu0 %v1120_v24  ;;  %1530 = vmatprep.subr.bf16.mxu1 %v1120_v24 }
 0x525   :  { %1501 = vmatpush3.bf16.msra.mxu0 %v1120_v24  ;;  %1538 = vmatpush3.bf16.msra.mxu1 %v1120_v24 }
 0x526   :  { %1502 = vmatprep.subr.bf16.mxu0 %v1119_v33  ;;  %1531 = vmatprep.subr.bf16.mxu1 %v1119_v33 }
 0x529   :  { %1503 = vmatpush3.bf16.msra.mxu0 %v1119_v33  ;;  %1539 = vmatpush3.bf16.msra.mxu1 %v1119_v33 }
 0x52a   :  { %1504 = vmatprep.subr.bf16.mxu0 %v1118_v34  ;;  %1532 = vmatprep.subr.bf16.mxu1 %v1118_v34 }
 0x52d   :  { %1505 = vmatpush3.bf16.msra.mxu0 %v1118_v34  ;;  %1540 = vmatpush3.bf16.msra.mxu1 %v1118_v34 }
 0x52e   :  { %1506 = vmatprep.subr.bf16.mxu0 %v1117_v0  ;;  %1533 = vmatprep.subr.bf16.mxu1 %v1117_v0 }
 0x531   :  { %1507 = vmatpush3.bf16.msra.mxu0 %v1117_v0  ;;  %1541 = vmatpush3.bf16.msra.mxu1 %v1117_v0 }
 0x532   :  { %1508 = vmatprep.subr.bf16.mxu0 %v1116_v35  ;;  %1534 = vmatprep.subr.bf16.mxu1 %v1116_v35 }
 0x535   :  { %1509 = vmatpush3.bf16.msra.mxu0 %v1116_v35  ;;  %1542 = vmatpush3.bf16.msra.mxu1 %v1116_v35 }
 0x536   :  { %1510 = vmatprep.subr.bf16.mxu0 %v1115_v36  ;;  %1535 = vmatprep.subr.bf16.mxu1 %v1115_v36 }
 0x539   :  { %1511 = vmatpush3.bf16.msra.mxu0 %v1115_v36  ;;  %1543 = vmatpush3.bf16.msra.mxu1 %v1115_v36 }
 0x53c   :  { %1513 = vmatmul.mubr.bf16.vlgmr.msra.gmra.mxu0 %v1891_v21  ;;  %1521 = vmatmul.mubr.bf16.vlgmr.msra.gmra.mxu1 %v1907_v25 }
 0x53d   :  { %1516 = vmatprep.mubr.bf16.mxu0 %v1895_v22  ;;  %1524 = vmatprep.mubr.bf16.mxu1 %v1911_v26 }
 0x544   :  { %1517 = vmatmul.mubr.bf16.gmra.mxu0 %v1899_v23  ;;  %1525 = vmatmul.mubr.bf16.gmra.mxu1 %v1915_v27 }
 0x5fc   :  { %v1514_v38 = vpop.f32.mrf.mxu0  ;;  %v1522_v39 = vpop.f32.mrf.mxu1 }
 0x5fd   :  { %v1173_v42 = vadd.f32 %v1514_v38, %v1319_v37  ;;  %v1205_v43 = vadd.f32 %v1522_v39, %v1319_v37 }
 0x5fe   :  { %v1164_v44 = vpop.f32.mrf.mxu0  ;;  %v1196_v21 = vpop.f32.mrf.mxu1 }
 0x5ff   :  { %1229 = vst [vmem:[#allocation11 + $0x10] sm:$0xff] %v1173_v42  ;;  %1237 = vst [vmem:[#allocation11 + $0x50] sm:$0xff] %v1205_v43  ;;  %v1165_v25 = vadd.f32 %v1319_v37, %v1164_v44  ;;  %v1197_v22 = vadd.f32 %v1319_v37, %v1196_v21 }
 0x600   :  { %v1515_v45 = vpop.f32.mrf.mxu0  ;;  %v1523_v26 = vpop.f32.mrf.mxu1 }
 0x601   :  { %1227 = vst [vmem:[#allocation11] sm:$0xff] %v1165_v25  ;;  %1235 = vst [vmem:[#allocation11 + $0x40] sm:$0xff] %v1197_v22  ;;  %v1176_v23 = vadd.f32 %v1515_v45, %v1319_v37  ;;  %v1208_v27 = vadd.f32 %v1523_v26, %v1319_v37 }
 0x602   :  { %v1167_v46 = vpop.f32.mrf.mxu0  ;;  %v1199_v47 = vpop.f32.mrf.mxu1 }
 0x603   :  { %1230 = vst [vmem:[#allocation11 + $0x18] sm:$0xff] %v1176_v23  ;;  %1238 = vst [vmem:[#allocation11 + $0x58] sm:$0xff] %v1208_v27  ;;  %v1168_v48 = vadd.f32 %v1319_v37, %v1167_v46  ;;  %v1200_v49 = vadd.f32 %v1319_v37, %v1199_v47 }
 0x604   :  { %v1518_v50 = vpop.f32.mrf.mxu0  ;;  %v1526_v51 = vpop.f32.mrf.mxu1 }
 0x605   :  { %1228 = vst [vmem:[#allocation11 + $0x8] sm:$0xff] %v1168_v48  ;;  %1236 = vst [vmem:[#allocation11 + $0x48] sm:$0xff] %v1200_v49  ;;  %v1189_v52 = vadd.f32 %v1518_v50, %v1319_v37  ;;  %v1221_v53 = vadd.f32 %v1526_v51, %v1319_v37 }
 0x606   :  { %v1180_v54 = vpop.f32.mrf.mxu0  ;;  %v1212_v55 = vpop.f32.mrf.mxu1 }
 0x607   :  { %1233 = vst [vmem:[#allocation11 + $0x30] sm:$0xff] %v1189_v52  ;;  %1241 = vst [vmem:[#allocation11 + $0x70] sm:$0xff] %v1221_v53  ;;  %v1181_v56 = vadd.f32 %v1319_v37, %v1180_v54  ;;  %v1213_v57 = vadd.f32 %v1319_v37, %v1212_v55 }
 0x608   :  { %v1519_v58 = vpop.f32.mrf.mxu0  ;;  %v1527_v59 = vpop.f32.mrf.mxu1 }
 0x609   :  { %1231 = vst [vmem:[#allocation11 + $0x20] sm:$0xff] %v1181_v56  ;;  %1239 = vst [vmem:[#allocation11 + $0x60] sm:$0xff] %v1213_v57  ;;  %v1192_v60 = vadd.f32 %v1519_v58, %v1319_v37  ;;  %v1224_v61 = vadd.f32 %v1527_v59, %v1319_v37 }
 0x60a   :  { %v1183_v62 = vpop.f32.mrf.mxu0  ;;  %v1215_v63 = vpop.f32.mrf.mxu1 }
 0x60b   :  { %1234 = vst [vmem:[#allocation11 + $0x38] sm:$0xff] %v1192_v60  ;;  %1242 = vst [vmem:[#allocation11 + $0x78] sm:$0xff] %v1224_v61  ;;  %v1184_v1 = vadd.f32 %v1319_v37, %v1183_v62  ;;  %v1216_v2 = vadd.f32 %v1319_v37, %v1215_v63 }
 0x60d   :  { %1232 = vst [vmem:[#allocation11 + $0x28] sm:$0xff] %v1184_v1  ;;  %1240 = vst [vmem:[#allocation11 + $0x68] sm:$0xff] %v1216_v2 }
 0x60e   :  { %1730 = shalt.err (!%p1727_p1)
}
 0x60f   :  { %1254 = dma.vmem_to_hbm [thread:$0]  %s1249_s11, 2048, %s1997_s8, [#allocation4], %s1753_s23, %s1753_s23, %s1754_s24  }
 0x610   :  { %1745 = dma.done.wait [#allocation4], 2048  }
 0x611   :  { %1746 = vsyncadd [#allocation4], 4294965248 }
 0x612   :  { %1258 = vsyncpa [#allocation3], 1 }
 0x613   :  { %1259 = vsyncpa [#allocation6], 1 }
 0x614   :  { %1260 = vsyncpa [#allocation9], 1 }
 0x615   :  { %1261 = vsyncpa [#allocation4], 1 }

</bundles_post_ra>
